<compile_context>
chip_gen: v7x
topology: tpu7x:2x2x1
jax: 0.10.0
libtpu: 0.0.40
codegen_flags: <defaults>
</compile_context>

<pallas_src>
import math
import functools

import jax
import jax.numpy as jnp
from jax import lax
from jax.experimental import pallas as pl
from jax.experimental.pallas import tpu as pltpu


def _co_attn_kernel(nhead, hd, S, E, Fdim,
                    x_ref, wqkv_ref, bqkv_ref, wof_ref, bof_ref, lnw_ref, lnb_ref,
                    o_ref):
    """One (stream, batch) grid step: self-attn + fused out-proj/FF + residual + LayerNorm."""
    x_bf16 = x_ref[0, 0]                          # (S, E) bf16, MXU operand
    x_f32 = x_bf16.astype(jnp.float32)            # residual path in f32

    # ff accumulates sum_h attn_h @ wof_h (head concat folded into out-proj); bias at end.
    ff = jnp.zeros((S, Fdim), jnp.float32)

    # Short static head loop (nhead is small); every matmul is full-rank over E or over S,
    # and no lane-narrow stores are emitted anywhere in the body.
    for h in range(nhead):
        # Per-head fused QKV projection: (S, E) @ (E, 3*hd), softmax scale pre-folded into
        # the Q columns.  Single bf16 cast of the (S, 3*hd) result (not per slice).
        qkv_h = (jnp.dot(x_bf16, wqkv_ref[0, h], preferred_element_type=jnp.float32)
                 + bqkv_ref[0, h]).astype(jnp.bfloat16)                      # (S, 3*hd)
        q = qkv_h[:, :hd]
        k = qkv_h[:, hd:2 * hd]
        v = qkv_h[:, 2 * hd:]

        # scores = q @ k.T without materializing a transposed operand.
        s = lax.dot_general(q, k, (((1,), (1,)), ((), ())),
                            preferred_element_type=jnp.float32)             # (S, S)
        s = s - jnp.max(s, axis=-1, keepdims=True)
        p = jnp.exp(s)
        p = p * pl.reciprocal(jnp.sum(p, axis=-1, keepdims=True), approx=True)

        attn_h = jnp.dot(p.astype(jnp.bfloat16), v,
                         preferred_element_type=jnp.float32)                 # (S, hd)

        # Fused (out-proj o FF) for this head: contract hd -> F, accumulate in f32.
        ff = ff + jnp.dot(attn_h.astype(jnp.bfloat16), wof_ref[0, h],
                          preferred_element_type=jnp.float32)                # (S, F)

    # Residual + LayerNorm(F) in f32 (F == E, asserted in the wrapper).  eps = 1e-5.
    res = x_f32 + ff + bof_ref[0]
    mu = jnp.mean(res, axis=-1, keepdims=True)
    var = jnp.mean((res - mu) ** 2, axis=-1, keepdims=True)
    normed = (res - mu) * lax.rsqrt(var + 1e-5)
    o_ref[0, 0] = normed * lnw_ref[0] + lnb_ref[0]


def _prepare_params(params_x, params_y, nhead):
    """Host-side prep: fold softmax scale into Q, fuse QKV per head, fuse out-proj with the
    FF linear, split weights per head (so the kernel never lane-slices activations narrowly),
    cast MXU weights to bf16, and stack the two streams along a leading axis."""
    def prep(p):
        E = p["wq"].shape[0]
        hd = E // nhead
        Fdim = p["w1"].shape[1]
        scale = 1.0 / math.sqrt(hd)

        def heads_cols(w):                       # (E, E) -> (nhead, E, hd)
            return jnp.transpose(w.reshape(E, nhead, hd), (1, 0, 2))

        def heads_bias(b):                       # (1, E) -> (nhead, 1, hd)
            return b.reshape(nhead, 1, hd)

        wqkv = jnp.concatenate([heads_cols(p["wq"] * scale),
                                heads_cols(p["wk"]),
                                heads_cols(p["wv"])], axis=-1)               # (nhead, E, 3hd)
        bqkv = jnp.concatenate([heads_bias(p["bq"] * scale),
                                heads_bias(p["bk"]),
                                heads_bias(p["bv"])], axis=-1)               # (nhead, 1, 3hd)
        w_of = jnp.dot(p["wo"], p["w1"]).reshape(nhead, hd, Fdim)            # (nhead, hd, F)
        b_of = jnp.dot(p["bo"], p["w1"]) + p["b1"]                           # (1, F)
        return (wqkv.astype(jnp.bfloat16), bqkv.astype(jnp.float32),
                w_of.astype(jnp.bfloat16), b_of.astype(jnp.float32),
                p["lnw"].astype(jnp.float32), p["lnb"].astype(jnp.float32))

    return tuple(jnp.stack([a, b], axis=0)
                 for a, b in zip(prep(params_x), prep(params_y)))


def _co_attention_call(xy, prepped, nhead, S, B, E, Fdim):
    hd = E // nhead

    def wspec(arr):
        nd = arr.ndim
        # Whole per-stream weight slab; block index ignores the batch axis so the weight
        # stays VMEM-resident across all batch grid steps of a stream.
        return pl.BlockSpec((1,) + arr.shape[1:],
                            lambda s, b, _nd=nd: (s,) + (0,) * (_nd - 1))

    kernel = functools.partial(_co_attn_kernel, nhead, hd, S, E, Fdim)
    return pl.pallas_call(
        kernel,
        out_shape=jax.ShapeDtypeStruct((2, B, S, Fdim), jnp.float32),
        grid=(2, B),
        in_specs=[pl.BlockSpec((1, 1, S, E), lambda s, b: (s, b, 0, 0))]
                 + [wspec(p) for p in prepped],
        out_specs=pl.BlockSpec((1, 1, S, Fdim), lambda s, b: (s, b, 0, 0)),
        compiler_params=pltpu.CompilerParams(
            dimension_semantics=("parallel", "parallel")),
    )(xy, *prepped)


def transformer_co_self_attention_layer(x_sbe, y_sbe, params_x, params_y, nhead=4):
    """Mirrors TransformerCoSelfAttentionLayer.forward (norm_first=False, no padding masks).

    x_sbe, y_sbe: (S, B, E), seq-first like PyTorch's MultiheadAttention inputs.
    Returns (out_x, out_y), each (S, B, F), float32.

    Weight convention: all weight matrices are (in, out) so the kernel computes x @ W + b.
    PyTorch nn.Linear / in_proj weights ((out, in)) must be transposed when loading.
    """
    S, B, E = x_sbe.shape
    Fdim = params_x["w1"].shape[1]
    if Fdim != E:
        raise ValueError(f"TransformerMLP residual requires ff_dim == emb_dim, got {Fdim} != {E}")
    if E % nhead != 0:
        raise ValueError("emb_dim must be divisible by nhead")

    # Pack both streams into a batch-major slab (2, B, S, E) in bf16 (halves input HBM
    # traffic; residual is re-upcast to f32 in-kernel).  The seq-first -> batch-major
    # layout change rides on this single small copy.
    xy = jnp.stack([jnp.transpose(x_sbe, (1, 0, 2)),
                    jnp.transpose(y_sbe, (1, 0, 2))], axis=0).astype(jnp.bfloat16)

    prepped = _prepare_params(params_x, params_y, nhead)
    out = _co_attention_call(xy, prepped, nhead, S, B, E, Fdim)    # (2, B, S, F) f32
    return jnp.transpose(out[0], (1, 0, 2)), jnp.transpose(out[1], (1, 0, 2))


def _init_params(key, emb_dim, ff_dim):
    ks = jax.random.split(key, 10)
    n = lambda k, shape: (0.02 * jax.random.normal(k, shape)).astype(jnp.float32)
    return {
        "wq": n(ks[0], (emb_dim, emb_dim)),          # (in, out) layout: kernel does x @ W
        "wk": n(ks[1], (emb_dim, emb_dim)),
        "wv": n(ks[2], (emb_dim, emb_dim)),
        "bq": n(ks[3], (1, emb_dim)),
        "bk": n(ks[4], (1, emb_dim)),
        "bv": n(ks[5], (1, emb_dim)),
        "wo": n(ks[6], (emb_dim, emb_dim)),
        "bo": n(ks[7], (1, emb_dim)),
        "w1": n(ks[8], (emb_dim, ff_dim)),           # TransformerMLP Linear(emb_dim -> ff_dim)
        "b1": n(ks[9], (1, ff_dim)),
        "lnw": jnp.ones((1, ff_dim), jnp.float32),   # LayerNorm(ff_dim) weight
        "lnb": jnp.zeros((1, ff_dim), jnp.float32),  # LayerNorm(ff_dim) bias
    }


def _reference_layer(x_sbe, p, nhead):
    """Pure-JAX f32 reference of one stream (norm_first=False, dropout=0, no mask)."""
    S, B, E = x_sbe.shape
    hd = E // nhead
    q = jnp.einsum('sbe,ef->sbf', x_sbe, p["wq"]) + p["bq"][0]
    k = jnp.einsum('sbe,ef->sbf', x_sbe, p["wk"]) + p["bk"][0]
    v = jnp.einsum('sbe,ef->sbf', x_sbe, p["wv"]) + p["bv"][0]
    q = q.reshape(S, B, nhead, hd) / math.sqrt(hd)
    k = k.reshape(S, B, nhead, hd)
    v = v.reshape(S, B, nhead, hd)
    scores = jnp.einsum('sbhd,tbhd->bhst', q, k)
    probs = jax.nn.softmax(scores, axis=-1)
    attn = jnp.einsum('bhst,tbhd->sbhd', probs, v).reshape(S, B, E)
    mha = jnp.einsum('sbe,ef->sbf', attn, p["wo"]) + p["bo"][0]
    ff = jnp.einsum('sbe,ef->sbf', mha, p["w1"]) + p["b1"][0]
    res = x_sbe + ff
    mu = res.mean(-1, keepdims=True)
    var = ((res - mu) ** 2).mean(-1, keepdims=True)
    return (res - mu) / jnp.sqrt(var + 1e-5) * p["lnw"][0] + p["lnb"][0]


if __name__ == "__main__":
    # Small shapes: seq=8, batch=2, emb=32, ff=32 (ff==emb as the residual requires), nhead=4.
    S, B, E, FF, NHEAD = 8, 2, 32, 32, 4

    key = jax.random.PRNGKey(0)
    kx, ky, kpx, kpy = jax.random.split(key, 4)
    x = jax.random.normal(kx, (S, B, E), dtype=jnp.float32)
    y = jax.random.normal(ky, (S, B, E), dtype=jnp.float32)
    params_x = _init_params(kpx, E, FF)
    params_y = _init_params(kpy, E, FF)

    out_x, out_y = transformer_co_self_attention_layer(x, y, params_x, params_y, nhead=NHEAD)
    jax.block_until_ready((out_x, out_y))
    assert out_x.shape == (S, B, FF) and out_y.shape == (S, B, FF)

    # Tolerance check vs. a pure-JAX f32 reference (bf16 activations / approx reciprocal
    # introduce ~1e-2-level absolute deviation on O(1) LayerNorm outputs).
    ref_x = _reference_layer(x, params_x, NHEAD)
    ref_y = _reference_layer(y, params_y, NHEAD)
    err = max(float(jnp.max(jnp.abs(out_x - ref_x))),
              float(jnp.max(jnp.abs(out_y - ref_y))))
    assert err < 5e-2, f"max abs error vs f32 reference too large: {err}"
    print("KERNEL_OK")
</pallas_src>

<mosaic_0001>
module attributes {stable_mosaic.version = 11 : i64} {
  func.func @_co_attn_kernel(%arg0: i32, %arg1: i32, %arg2: memref<1x1x8x32xbf16, #tpu.memory_space<vmem>>, %arg3: memref<1x4x32x24xbf16, #tpu.memory_space<vmem>>, %arg4: memref<1x4x1x24xf32, #tpu.memory_space<vmem>>, %arg5: memref<1x4x8x32xbf16, #tpu.memory_space<vmem>>, %arg6: memref<1x1x32xf32, #tpu.memory_space<vmem>>, %arg7: memref<1x1x32xf32, #tpu.memory_space<vmem>>, %arg8: memref<1x1x32xf32, #tpu.memory_space<vmem>>, %arg9: memref<1x1x8x32xf32, #tpu.memory_space<vmem>>) attributes {dimension_semantics = [#tpu.dimension_semantics<parallel>, #tpu.dimension_semantics<parallel>], iteration_bounds = array<i64: 2, 2>, scalar_prefetch = 0 : i64, scratch_operands = 0 : i64, tpu.core_type = #tpu.core_type<tc>, window_params = [{transform_indices = @transform_0, window_bounds = array<i64: 1, 1, 8, 32>}, {transform_indices = @transform_1, window_bounds = array<i64: 1, 4, 32, 24>}, {transform_indices = @transform_2, window_bounds = array<i64: 1, 4, 1, 24>}, {transform_indices = @transform_3, window_bounds = array<i64: 1, 4, 8, 32>}, {transform_indices = @transform_4, window_bounds = array<i64: 1, 1, 32>}, {transform_indices = @transform_5, window_bounds = array<i64: 1, 1, 32>}, {transform_indices = @transform_6, window_bounds = array<i64: 1, 1, 32>}, {transform_indices = @transform_7, window_bounds = array<i64: 1, 1, 8, 32>}]} {
    %c0 = arith.constant 0 : index
    %c0_0 = arith.constant 0 : index
    %c0_1 = arith.constant 0 : index
    %c0_2 = arith.constant 0 : index
    %0 = vector.load %arg2[%c0, %c0_0, %c0_1, %c0_2] : memref<1x1x8x32xbf16, #tpu.memory_space<vmem>>, vector<1x1x8x32xbf16>
    %1 = vector.shape_cast %0 : vector<1x1x8x32xbf16> to vector<8x32xbf16>
    %2 = arith.extf %1 : vector<8x32xbf16> to vector<8x32xf32>
    %cst = arith.constant 0.000000e+00 : f32
    %3 = vector.broadcast %cst : f32 to vector<8x32xf32>
    %c0_3 = arith.constant 0 : index
    %c0_4 = arith.constant 0 : index
    %c0_5 = arith.constant 0 : index
    %c0_6 = arith.constant 0 : index
    %4 = vector.load %arg3[%c0_3, %c0_4, %c0_5, %c0_6] : memref<1x4x32x24xbf16, #tpu.memory_space<vmem>>, vector<1x1x32x24xbf16>
    %5 = vector.shape_cast %4 : vector<1x1x32x24xbf16> to vector<32x24xbf16>
    %cst_7 = arith.constant dense<0.000000e+00> : vector<8x24xf32>
    %6 = tpu.matmul %1, %5, %cst_7 {dimension_numbers = #tpu.dot_dimension_numbers<[1], [0], [0], [1], [0, 0, 1, 1], [], []>} : vector<8x32xbf16>, vector<32x24xbf16>, vector<8x24xf32> -> vector<8x24xf32>
    %c0_8 = arith.constant 0 : index
    %c0_9 = arith.constant 0 : index
    %c0_10 = arith.constant 0 : index
    %c0_11 = arith.constant 0 : index
    %7 = vector.load %arg4[%c0_8, %c0_9, %c0_10, %c0_11] : memref<1x4x1x24xf32, #tpu.memory_space<vmem>>, vector<1x1x1x24xf32>
    %8 = vector.shape_cast %7 : vector<1x1x1x24xf32> to vector<1x24xf32>
    %9 = vector.broadcast %8 : vector<1x24xf32> to vector<8x24xf32>
    %10 = arith.addf %6, %9 : vector<8x24xf32>
    %11 = arith.truncf %10 : vector<8x24xf32> to vector<8x24xbf16>
    %12 = vector.extract_strided_slice %11 {offsets = [0, 0], sizes = [8, 8], strides = [1, 1]} : vector<8x24xbf16> to vector<8x8xbf16>
    %13 = vector.extract_strided_slice %11 {offsets = [0, 8], sizes = [8, 8], strides = [1, 1]} : vector<8x24xbf16> to vector<8x8xbf16>
    %14 = vector.extract_strided_slice %11 {offsets = [0, 16], sizes = [8, 8], strides = [1, 1]} : vector<8x24xbf16> to vector<8x8xbf16>
    %cst_12 = arith.constant dense<0.000000e+00> : vector<8x8xf32>
    %15 = tpu.matmul %12, %13, %cst_12 {dimension_numbers = #tpu.dot_dimension_numbers<[1], [1], [0], [0], [0, 0, 1, 0], [], []>} : vector<8x8xbf16>, vector<8x8xbf16>, vector<8x8xf32> -> vector<8x8xf32>
    %cst_13 = arith.constant dense<0xFF800000> : vector<8xf32>
    %16 = vector.multi_reduction <maximumf>, %15, %cst_13 [1] : vector<8x8xf32> to vector<8xf32>
    %17 = vector.shape_cast %16 : vector<8xf32> to vector<8x1xf32>
    %18 = vector.broadcast %17 : vector<8x1xf32> to vector<8x8xf32>
    %19 = arith.subf %15, %18 : vector<8x8xf32>
    %20 = math.exp %19 : vector<8x8xf32>
    %cst_14 = arith.constant dense<0.000000e+00> : vector<8xf32>
    %21 = vector.multi_reduction <add>, %20, %cst_14 [1] : vector<8x8xf32> to vector<8xf32>
    %22 = vector.shape_cast %21 : vector<8xf32> to vector<8x1xf32>
    %23 = tpu.reciprocal %22 {approx = true} : vector<8x1xf32> -> vector<8x1xf32>
    %24 = vector.broadcast %23 : vector<8x1xf32> to vector<8x8xf32>
    %25 = arith.mulf %20, %24 : vector<8x8xf32>
    %26 = arith.truncf %25 : vector<8x8xf32> to vector<8x8xbf16>
    %cst_15 = arith.constant dense<0.000000e+00> : vector<8x8xf32>
    %27 = tpu.matmul %26, %14, %cst_15 {dimension_numbers = #tpu.dot_dimension_numbers<[1], [0], [0], [1], [0, 0, 1, 1], [], []>} : vector<8x8xbf16>, vector<8x8xbf16>, vector<8x8xf32> -> vector<8x8xf32>
    %28 = arith.truncf %27 : vector<8x8xf32> to vector<8x8xbf16>
    %c0_16 = arith.constant 0 : index
    %c0_17 = arith.constant 0 : index
    %c0_18 = arith.constant 0 : index
    %c0_19 = arith.constant 0 : index
    %29 = vector.load %arg5[%c0_16, %c0_17, %c0_18, %c0_19] : memref<1x4x8x32xbf16, #tpu.memory_space<vmem>>, vector<1x1x8x32xbf16>
    %30 = vector.shape_cast %29 : vector<1x1x8x32xbf16> to vector<8x32xbf16>
    %cst_20 = arith.constant dense<0.000000e+00> : vector<8x32xf32>
    %31 = tpu.matmul %28, %30, %cst_20 {dimension_numbers = #tpu.dot_dimension_numbers<[1], [0], [0], [1], [0, 0, 1, 1], [], []>} : vector<8x8xbf16>, vector<8x32xbf16>, vector<8x32xf32> -> vector<8x32xf32>
    %32 = arith.addf %3, %31 : vector<8x32xf32>
    %c0_21 = arith.constant 0 : index
    %c1 = arith.constant 1 : index
    %c0_22 = arith.constant 0 : index
    %c0_23 = arith.constant 0 : index
    %33 = vector.load %arg3[%c0_21, %c1, %c0_22, %c0_23] : memref<1x4x32x24xbf16, #tpu.memory_space<vmem>>, vector<1x1x32x24xbf16>
    %34 = vector.shape_cast %33 : vector<1x1x32x24xbf16> to vector<32x24xbf16>
    %cst_24 = arith.constant dense<0.000000e+00> : vector<8x24xf32>
    %35 = tpu.matmul %1, %34, %cst_24 {dimension_numbers = #tpu.dot_dimension_numbers<[1], [0], [0], [1], [0, 0, 1, 1], [], []>} : vector<8x32xbf16>, vector<32x24xbf16>, vector<8x24xf32> -> vector<8x24xf32>
    %c0_25 = arith.constant 0 : index
    %c1_26 = arith.constant 1 : index
    %c0_27 = arith.constant 0 : index
    %c0_28 = arith.constant 0 : index
    %36 = vector.load %arg4[%c0_25, %c1_26, %c0_27, %c0_28] : memref<1x4x1x24xf32, #tpu.memory_space<vmem>>, vector<1x1x1x24xf32>
    %37 = vector.shape_cast %36 : vector<1x1x1x24xf32> to vector<1x24xf32>
    %38 = vector.broadcast %37 : vector<1x24xf32> to vector<8x24xf32>
    %39 = arith.addf %35, %38 : vector<8x24xf32>
    %40 = arith.truncf %39 : vector<8x24xf32> to vector<8x24xbf16>
    %41 = vector.extract_strided_slice %40 {offsets = [0, 0], sizes = [8, 8], strides = [1, 1]} : vector<8x24xbf16> to vector<8x8xbf16>
    %42 = vector.extract_strided_slice %40 {offsets = [0, 8], sizes = [8, 8], strides = [1, 1]} : vector<8x24xbf16> to vector<8x8xbf16>
    %43 = vector.extract_strided_slice %40 {offsets = [0, 16], sizes = [8, 8], strides = [1, 1]} : vector<8x24xbf16> to vector<8x8xbf16>
    %cst_29 = arith.constant dense<0.000000e+00> : vector<8x8xf32>
    %44 = tpu.matmul %41, %42, %cst_29 {dimension_numbers = #tpu.dot_dimension_numbers<[1], [1], [0], [0], [0, 0, 1, 0], [], []>} : vector<8x8xbf16>, vector<8x8xbf16>, vector<8x8xf32> -> vector<8x8xf32>
    %cst_30 = arith.constant dense<0xFF800000> : vector<8xf32>
    %45 = vector.multi_reduction <maximumf>, %44, %cst_30 [1] : vector<8x8xf32> to vector<8xf32>
    %46 = vector.shape_cast %45 : vector<8xf32> to vector<8x1xf32>
    %47 = vector.broadcast %46 : vector<8x1xf32> to vector<8x8xf32>
    %48 = arith.subf %44, %47 : vector<8x8xf32>
    %49 = math.exp %48 : vector<8x8xf32>
    %cst_31 = arith.constant dense<0.000000e+00> : vector<8xf32>
    %50 = vector.multi_reduction <add>, %49, %cst_31 [1] : vector<8x8xf32> to vector<8xf32>
    %51 = vector.shape_cast %50 : vector<8xf32> to vector<8x1xf32>
    %52 = tpu.reciprocal %51 {approx = true} : vector<8x1xf32> -> vector<8x1xf32>
    %53 = vector.broadcast %52 : vector<8x1xf32> to vector<8x8xf32>
    %54 = arith.mulf %49, %53 : vector<8x8xf32>
    %55 = arith.truncf %54 : vector<8x8xf32> to vector<8x8xbf16>
    %cst_32 = arith.constant dense<0.000000e+00> : vector<8x8xf32>
    %56 = tpu.matmul %55, %43, %cst_32 {dimension_numbers = #tpu.dot_dimension_numbers<[1], [0], [0], [1], [0, 0, 1, 1], [], []>} : vector<8x8xbf16>, vector<8x8xbf16>, vector<8x8xf32> -> vector<8x8xf32>
    %57 = arith.truncf %56 : vector<8x8xf32> to vector<8x8xbf16>
    %c0_33 = arith.constant 0 : index
    %c1_34 = arith.constant 1 : index
    %c0_35 = arith.constant 0 : index
    %c0_36 = arith.constant 0 : index
    %58 = vector.load %arg5[%c0_33, %c1_34, %c0_35, %c0_36] : memref<1x4x8x32xbf16, #tpu.memory_space<vmem>>, vector<1x1x8x32xbf16>
    %59 = vector.shape_cast %58 : vector<1x1x8x32xbf16> to vector<8x32xbf16>
    %cst_37 = arith.constant dense<0.000000e+00> : vector<8x32xf32>
    %60 = tpu.matmul %57, %59, %cst_37 {dimension_numbers = #tpu.dot_dimension_numbers<[1], [0], [0], [1], [0, 0, 1, 1], [], []>} : vector<8x8xbf16>, vector<8x32xbf16>, vector<8x32xf32> -> vector<8x32xf32>
    %61 = arith.addf %32, %60 : vector<8x32xf32>
    %c0_38 = arith.constant 0 : index
    %c2 = arith.constant 2 : index
    %c0_39 = arith.constant 0 : index
    %c0_40 = arith.constant 0 : index
    %62 = vector.load %arg3[%c0_38, %c2, %c0_39, %c0_40] : memref<1x4x32x24xbf16, #tpu.memory_space<vmem>>, vector<1x1x32x24xbf16>
    %63 = vector.shape_cast %62 : vector<1x1x32x24xbf16> to vector<32x24xbf16>
    %cst_41 = arith.constant dense<0.000000e+00> : vector<8x24xf32>
    %64 = tpu.matmul %1, %63, %cst_41 {dimension_numbers = #tpu.dot_dimension_numbers<[1], [0], [0], [1], [0, 0, 1, 1], [], []>} : vector<8x32xbf16>, vector<32x24xbf16>, vector<8x24xf32> -> vector<8x24xf32>
    %c0_42 = arith.constant 0 : index
    %c2_43 = arith.constant 2 : index
    %c0_44 = arith.constant 0 : index
    %c0_45 = arith.constant 0 : index
    %65 = vector.load %arg4[%c0_42, %c2_43, %c0_44, %c0_45] : memref<1x4x1x24xf32, #tpu.memory_space<vmem>>, vector<1x1x1x24xf32>
    %66 = vector.shape_cast %65 : vector<1x1x1x24xf32> to vector<1x24xf32>
    %67 = vector.broadcast %66 : vector<1x24xf32> to vector<8x24xf32>
    %68 = arith.addf %64, %67 : vector<8x24xf32>
    %69 = arith.truncf %68 : vector<8x24xf32> to vector<8x24xbf16>
    %70 = vector.extract_strided_slice %69 {offsets = [0, 0], sizes = [8, 8], strides = [1, 1]} : vector<8x24xbf16> to vector<8x8xbf16>
    %71 = vector.extract_strided_slice %69 {offsets = [0, 8], sizes = [8, 8], strides = [1, 1]} : vector<8x24xbf16> to vector<8x8xbf16>
    %72 = vector.extract_strided_slice %69 {offsets = [0, 16], sizes = [8, 8], strides = [1, 1]} : vector<8x24xbf16> to vector<8x8xbf16>
    %cst_46 = arith.constant dense<0.000000e+00> : vector<8x8xf32>
    %73 = tpu.matmul %70, %71, %cst_46 {dimension_numbers = #tpu.dot_dimension_numbers<[1], [1], [0], [0], [0, 0, 1, 0], [], []>} : vector<8x8xbf16>, vector<8x8xbf16>, vector<8x8xf32> -> vector<8x8xf32>
    %cst_47 = arith.constant dense<0xFF800000> : vector<8xf32>
    %74 = vector.multi_reduction <maximumf>, %73, %cst_47 [1] : vector<8x8xf32> to vector<8xf32>
    %75 = vector.shape_cast %74 : vector<8xf32> to vector<8x1xf32>
    %76 = vector.broadcast %75 : vector<8x1xf32> to vector<8x8xf32>
    %77 = arith.subf %73, %76 : vector<8x8xf32>
    %78 = math.exp %77 : vector<8x8xf32>
    %cst_48 = arith.constant dense<0.000000e+00> : vector<8xf32>
    %79 = vector.multi_reduction <add>, %78, %cst_48 [1] : vector<8x8xf32> to vector<8xf32>
    %80 = vector.shape_cast %79 : vector<8xf32> to vector<8x1xf32>
    %81 = tpu.reciprocal %80 {approx = true} : vector<8x1xf32> -> vector<8x1xf32>
    %82 = vector.broadcast %81 : vector<8x1xf32> to vector<8x8xf32>
    %83 = arith.mulf %78, %82 : vector<8x8xf32>
    %84 = arith.truncf %83 : vector<8x8xf32> to vector<8x8xbf16>
    %cst_49 = arith.constant dense<0.000000e+00> : vector<8x8xf32>
    %85 = tpu.matmul %84, %72, %cst_49 {dimension_numbers = #tpu.dot_dimension_numbers<[1], [0], [0], [1], [0, 0, 1, 1], [], []>} : vector<8x8xbf16>, vector<8x8xbf16>, vector<8x8xf32> -> vector<8x8xf32>
    %86 = arith.truncf %85 : vector<8x8xf32> to vector<8x8xbf16>
    %c0_50 = arith.constant 0 : index
    %c2_51 = arith.constant 2 : index
    %c0_52 = arith.constant 0 : index
    %c0_53 = arith.constant 0 : index
    %87 = vector.load %arg5[%c0_50, %c2_51, %c0_52, %c0_53] : memref<1x4x8x32xbf16, #tpu.memory_space<vmem>>, vector<1x1x8x32xbf16>
    %88 = vector.shape_cast %87 : vector<1x1x8x32xbf16> to vector<8x32xbf16>
    %cst_54 = arith.constant dense<0.000000e+00> : vector<8x32xf32>
    %89 = tpu.matmul %86, %88, %cst_54 {dimension_numbers = #tpu.dot_dimension_numbers<[1], [0], [0], [1], [0, 0, 1, 1], [], []>} : vector<8x8xbf16>, vector<8x32xbf16>, vector<8x32xf32> -> vector<8x32xf32>
    %90 = arith.addf %61, %89 : vector<8x32xf32>
    %c0_55 = arith.constant 0 : index
    %c3 = arith.constant 3 : index
    %c0_56 = arith.constant 0 : index
    %c0_57 = arith.constant 0 : index
    %91 = vector.load %arg3[%c0_55, %c3, %c0_56, %c0_57] : memref<1x4x32x24xbf16, #tpu.memory_space<vmem>>, vector<1x1x32x24xbf16>
    %92 = vector.shape_cast %91 : vector<1x1x32x24xbf16> to vector<32x24xbf16>
    %cst_58 = arith.constant dense<0.000000e+00> : vector<8x24xf32>
    %93 = tpu.matmul %1, %92, %cst_58 {dimension_numbers = #tpu.dot_dimension_numbers<[1], [0], [0], [1], [0, 0, 1, 1], [], []>} : vector<8x32xbf16>, vector<32x24xbf16>, vector<8x24xf32> -> vector<8x24xf32>
    %c0_59 = arith.constant 0 : index
    %c3_60 = arith.constant 3 : index
    %c0_61 = arith.constant 0 : index
    %c0_62 = arith.constant 0 : index
    %94 = vector.load %arg4[%c0_59, %c3_60, %c0_61, %c0_62] : memref<1x4x1x24xf32, #tpu.memory_space<vmem>>, vector<1x1x1x24xf32>
    %95 = vector.shape_cast %94 : vector<1x1x1x24xf32> to vector<1x24xf32>
    %96 = vector.broadcast %95 : vector<1x24xf32> to vector<8x24xf32>
    %97 = arith.addf %93, %96 : vector<8x24xf32>
    %98 = arith.truncf %97 : vector<8x24xf32> to vector<8x24xbf16>
    %99 = vector.extract_strided_slice %98 {offsets = [0, 0], sizes = [8, 8], strides = [1, 1]} : vector<8x24xbf16> to vector<8x8xbf16>
    %100 = vector.extract_strided_slice %98 {offsets = [0, 8], sizes = [8, 8], strides = [1, 1]} : vector<8x24xbf16> to vector<8x8xbf16>
    %101 = vector.extract_strided_slice %98 {offsets = [0, 16], sizes = [8, 8], strides = [1, 1]} : vector<8x24xbf16> to vector<8x8xbf16>
    %cst_63 = arith.constant dense<0.000000e+00> : vector<8x8xf32>
    %102 = tpu.matmul %99, %100, %cst_63 {dimension_numbers = #tpu.dot_dimension_numbers<[1], [1], [0], [0], [0, 0, 1, 0], [], []>} : vector<8x8xbf16>, vector<8x8xbf16>, vector<8x8xf32> -> vector<8x8xf32>
    %cst_64 = arith.constant dense<0xFF800000> : vector<8xf32>
    %103 = vector.multi_reduction <maximumf>, %102, %cst_64 [1] : vector<8x8xf32> to vector<8xf32>
    %104 = vector.shape_cast %103 : vector<8xf32> to vector<8x1xf32>
    %105 = vector.broadcast %104 : vector<8x1xf32> to vector<8x8xf32>
    %106 = arith.subf %102, %105 : vector<8x8xf32>
    %107 = math.exp %106 : vector<8x8xf32>
    %cst_65 = arith.constant dense<0.000000e+00> : vector<8xf32>
    %108 = vector.multi_reduction <add>, %107, %cst_65 [1] : vector<8x8xf32> to vector<8xf32>
    %109 = vector.shape_cast %108 : vector<8xf32> to vector<8x1xf32>
    %110 = tpu.reciprocal %109 {approx = true} : vector<8x1xf32> -> vector<8x1xf32>
    %111 = vector.broadcast %110 : vector<8x1xf32> to vector<8x8xf32>
    %112 = arith.mulf %107, %111 : vector<8x8xf32>
    %113 = arith.truncf %112 : vector<8x8xf32> to vector<8x8xbf16>
    %cst_66 = arith.constant dense<0.000000e+00> : vector<8x8xf32>
    %114 = tpu.matmul %113, %101, %cst_66 {dimension_numbers = #tpu.dot_dimension_numbers<[1], [0], [0], [1], [0, 0, 1, 1], [], []>} : vector<8x8xbf16>, vector<8x8xbf16>, vector<8x8xf32> -> vector<8x8xf32>
    %115 = arith.truncf %114 : vector<8x8xf32> to vector<8x8xbf16>
    %c0_67 = arith.constant 0 : index
    %c3_68 = arith.constant 3 : index
    %c0_69 = arith.constant 0 : index
    %c0_70 = arith.constant 0 : index
    %116 = vector.load %arg5[%c0_67, %c3_68, %c0_69, %c0_70] : memref<1x4x8x32xbf16, #tpu.memory_space<vmem>>, vector<1x1x8x32xbf16>
    %117 = vector.shape_cast %116 : vector<1x1x8x32xbf16> to vector<8x32xbf16>
    %cst_71 = arith.constant dense<0.000000e+00> : vector<8x32xf32>
    %118 = tpu.matmul %115, %117, %cst_71 {dimension_numbers = #tpu.dot_dimension_numbers<[1], [0], [0], [1], [0, 0, 1, 1], [], []>} : vector<8x8xbf16>, vector<8x32xbf16>, vector<8x32xf32> -> vector<8x32xf32>
    %119 = arith.addf %90, %118 : vector<8x32xf32>
    %120 = arith.addf %2, %119 : vector<8x32xf32>
    %c0_72 = arith.constant 0 : index
    %c0_73 = arith.constant 0 : index
    %c0_74 = arith.constant 0 : index
    %121 = vector.load %arg6[%c0_72, %c0_73, %c0_74] : memref<1x1x32xf32, #tpu.memory_space<vmem>>, vector<1x1x32xf32>
    %122 = vector.shape_cast %121 : vector<1x1x32xf32> to vector<1x32xf32>
    %123 = vector.broadcast %122 : vector<1x32xf32> to vector<8x32xf32>
    %124 = arith.addf %120, %123 : vector<8x32xf32>
    %cst_75 = arith.constant dense<0.000000e+00> : vector<8xf32>
    %125 = vector.multi_reduction <add>, %124, %cst_75 [1] : vector<8x32xf32> to vector<8xf32>
    %126 = vector.shape_cast %125 : vector<8xf32> to vector<8x1xf32>
    %cst_76 = arith.constant 3.200000e+01 : f32
    %127 = vector.broadcast %cst_76 : f32 to vector<8x1xf32>
    %128 = arith.divf %126, %127 : vector<8x1xf32>
    %129 = vector.broadcast %128 : vector<8x1xf32> to vector<8x32xf32>
    %130 = arith.subf %124, %129 : vector<8x32xf32>
    %131 = arith.mulf %130, %130 : vector<8x32xf32>
    %cst_77 = arith.constant dense<0.000000e+00> : vector<8xf32>
    %132 = vector.multi_reduction <add>, %131, %cst_77 [1] : vector<8x32xf32> to vector<8xf32>
    %133 = vector.shape_cast %132 : vector<8xf32> to vector<8x1xf32>
    %cst_78 = arith.constant 3.200000e+01 : f32
    %134 = vector.broadcast %cst_78 : f32 to vector<8x1xf32>
    %135 = arith.divf %133, %134 : vector<8x1xf32>
    %136 = vector.broadcast %128 : vector<8x1xf32> to vector<8x32xf32>
    %137 = arith.subf %124, %136 : vector<8x32xf32>
    %cst_79 = arith.constant 9.99999974E-6 : f32
    %138 = vector.broadcast %cst_79 : f32 to vector<8x1xf32>
    %139 = arith.addf %135, %138 : vector<8x1xf32>
    %140 = math.rsqrt %139 : vector<8x1xf32>
    %141 = vector.broadcast %140 : vector<8x1xf32> to vector<8x32xf32>
    %142 = arith.mulf %137, %141 : vector<8x32xf32>
    %c0_80 = arith.constant 0 : index
    %c0_81 = arith.constant 0 : index
    %c0_82 = arith.constant 0 : index
    %143 = vector.load %arg7[%c0_80, %c0_81, %c0_82] : memref<1x1x32xf32, #tpu.memory_space<vmem>>, vector<1x1x32xf32>
    %144 = vector.shape_cast %143 : vector<1x1x32xf32> to vector<1x32xf32>
    %145 = vector.broadcast %144 : vector<1x32xf32> to vector<8x32xf32>
    %146 = arith.mulf %142, %145 : vector<8x32xf32>
    %c0_83 = arith.constant 0 : index
    %c0_84 = arith.constant 0 : index
    %c0_85 = arith.constant 0 : index
    %147 = vector.load %arg8[%c0_83, %c0_84, %c0_85] : memref<1x1x32xf32, #tpu.memory_space<vmem>>, vector<1x1x32xf32>
    %148 = vector.shape_cast %147 : vector<1x1x32xf32> to vector<1x32xf32>
    %149 = vector.broadcast %148 : vector<1x32xf32> to vector<8x32xf32>
    %150 = arith.addf %146, %149 : vector<8x32xf32>
    %c0_86 = arith.constant 0 : index
    %c0_87 = arith.constant 0 : index
    %c0_88 = arith.constant 0 : index
    %c0_89 = arith.constant 0 : index
    %151 = vector.load %arg9[%c0_86, %c0_87, %c0_88, %c0_89] : memref<1x1x8x32xf32, #tpu.memory_space<vmem>>, vector<1x1x8x32xf32>
    %152 = vector.shape_cast %151 : vector<1x1x8x32xf32> to vector<8x32xf32>
    %153 = vector.shape_cast %150 : vector<8x32xf32> to vector<1x1x8x32xf32>
    tpu.vector_store %arg9[%c0_86, %c0_87, %c0_88, %c0_89], %153 {strides = array<i32>} : memref<1x1x8x32xf32, #tpu.memory_space<vmem>>, vector<1x1x8x32xf32>,
    return
  }
  func.func @transform_0(%arg0: i32, %arg1: i32) -> (i32, i32, i32, i32) {
    %c0_i32 = arith.constant 0 : i32
    %c0_i32_0 = arith.constant 0 : i32
    %c0_i32_1 = arith.constant 0 : i32
    return %arg0, %arg1, %c0_i32, %c0_i32_0 : i32, i32, i32, i32
  }
  func.func @transform_1(%arg0: i32, %arg1: i32) -> (i32, i32, i32, i32) {
    %c0_i32 = arith.constant 0 : i32
    %c0_i32_0 = arith.constant 0 : i32
    %c0_i32_1 = arith.constant 0 : i32
    %c0_i32_2 = arith.constant 0 : i32
    return %arg0, %c0_i32, %c0_i32_0, %c0_i32_1 : i32, i32, i32, i32
  }
  func.func @transform_2(%arg0: i32, %arg1: i32) -> (i32, i32, i32, i32) {
    %c0_i32 = arith.constant 0 : i32
    %c0_i32_0 = arith.constant 0 : i32
    %c0_i32_1 = arith.constant 0 : i32
    %c0_i32_2 = arith.constant 0 : i32
    return %arg0, %c0_i32, %c0_i32_0, %c0_i32_1 : i32, i32, i32, i32
  }
  func.func @transform_3(%arg0: i32, %arg1: i32) -> (i32, i32, i32, i32) {
    %c0_i32 = arith.constant 0 : i32
    %c0_i32_0 = arith.constant 0 : i32
    %c0_i32_1 = arith.constant 0 : i32
    %c0_i32_2 = arith.constant 0 : i32
    return %arg0, %c0_i32, %c0_i32_0, %c0_i32_1 : i32, i32, i32, i32
  }
  func.func @transform_4(%arg0: i32, %arg1: i32) -> (i32, i32, i32) {
    %c0_i32 = arith.constant 0 : i32
    %c0_i32_0 = arith.constant 0 : i32
    %c0_i32_1 = arith.constant 0 : i32
    return %arg0, %c0_i32, %c0_i32_0 : i32, i32, i32
  }
  func.func @transform_5(%arg0: i32, %arg1: i32) -> (i32, i32, i32) {
    %c0_i32 = arith.constant 0 : i32
    %c0_i32_0 = arith.constant 0 : i32
    %c0_i32_1 = arith.constant 0 : i32
    return %arg0, %c0_i32, %c0_i32_0 : i32, i32, i32
  }
  func.func @transform_6(%arg0: i32, %arg1: i32) -> (i32, i32, i32) {
    %c0_i32 = arith.constant 0 : i32
    %c0_i32_0 = arith.constant 0 : i32
    %c0_i32_1 = arith.constant 0 : i32
    return %arg0, %c0_i32, %c0_i32_0 : i32, i32, i32
  }
  func.func @transform_7(%arg0: i32, %arg1: i32) -> (i32, i32, i32, i32) {
    %c0_i32 = arith.constant 0 : i32
    %c0_i32_0 = arith.constant 0 : i32
    %c0_i32_1 = arith.constant 0 : i32
    return %arg0, %arg1, %c0_i32, %c0_i32_0 : i32, i32, i32, i32
  }
}

</mosaic_0001>

<bundles_post_ra>
// kernel: tpu_custom_call.1
= control target key start
LH: loop header
LB: loop body
LE: loop exit
PB: predicated region body
PF: predicated region fallthrough
CT: control target
= control target key end

     0   :  { %s2248_s0 = inlined_call_operand.vmem [shape: bf16[2,2,8,32], index: 0, kind: input, shape index: {}]   ;;  %s2249_s1 = inlined_call_operand.vmem [shape: bf16[2,4,32,24], index: 1, kind: input, shape index: {}]   ;;  %s2250_s2 = inlined_call_operand.vmem [shape: f32[2,4,1,24], index: 2, kind: input, shape index: {}]   ;;  %s2251_s3 = inlined_call_operand.vmem [shape: bf16[2,4,8,32], index: 3, kind: input, shape index: {}]   ;;  %s2252_s4 = inlined_call_operand.vmem [shape: f32[2,1,32], index: 4, kind: input, shape index: {}]   ;;  %s2253_s5 = inlined_call_operand.vmem [shape: f32[2,1,32], index: 5, kind: input, shape index: {}]   ;;  %s2254_s6 = inlined_call_operand.vmem [shape: f32[2,1,32], index: 6, kind: input, shape index: {}]   ;;  %s2255_s7 = inlined_call_operand.hbm [shape: f32[2,2,8,32], index: 7, kind: output, shape index: {}]  }
   0x1   :  { %2258 = sst [smem:[#allocation7_spill]] %s2248_s0 }
   0x2   :  { %2259 = sst [smem:[#allocation8_spill]] %s2249_s1 }
   0x3   :  { %2260 = sst [smem:[#allocation9_spill]] %s2250_s2 }
   0x4   :  { %12 = vsyncpa [#allocation3], 0 }
   0x5   :  { %14 = vsyncpa [#allocation3 + $0x1], 0  ;;  %s1953_s24 = smov 0   ;;  %s1955_s25 = smov 0  }
   0x6   :  { %s1957_s26 = smov 0   ;;  %s1959_s27 = smov 0  }
   0x7   :  { %s1961_s28 = smov 0   ;;  %s1963_s29 = smov 0  }
   0x8   :  { %s1965_s30 = smov 0   ;;  %s1967_s8 = smov 0  }
   0x9 LB: > { %s1502_s9 = sadd.s32 4294967295, %s1906_s8   ;;  %s1503_s10 = sadd.s32 4294967294, %s1906_s8   ;;  %s1906_s8 = sphi %s1967_s8, %s20_s8   ;;  %s1902_s30 = sphi %s1965_s30, %s2276_s30   ;;  %s1898_s29 = sphi %s1963_s29, %s2275_s29   ;;  %s1894_s28 = sphi %s1961_s28, %s2274_s28   ;;  %s1890_s27 = sphi %s1959_s27, %s2273_s27   ;;  %s1886_s26 = sphi %s1957_s26, %s2272_s26   ;;  %s1882_s25 = sphi %s1955_s25, %s2271_s25   ;;  %s1878_s24 = sphi %s1953_s24, %s2270_s24  }
   0xa   : > { %s29_s11 = sadd.s32 1, %s1898_s29  ;;  %s32_s12 = sadd.s32 1, %s1902_s30 }
   0xb   : > { %p30_p0 = scmp.ge.s32.totalorder %s29_s11, 2  ;;  %p235_p1 = scmp.ne.s32.totalorder %s1886_s26, %s1882_s25 }
   0xc   : > { %p236_p2 = scmp.eq.s32.totalorder %s1502_s9, 3  ;;  %p241_p5 = scmp.ne.s32.totalorder %s1882_s25, %s1878_s24 }
   0xd   : > { %s2278_s11 = smov (%p30_p0, %s29_s11), 0  ;;  %s2280_s12 = smov (!%p30_p0, %s32_s12), %s1902_s30 }
   0xe   : > { %2261 = sst [smem:[#allocation5_spill]] %s2278_s11  ;;  %s221_s13 = ssub.s32 %s1898_s29, %s2278_s11 }
   0xf   : > { %p2004_p3 = por %p236_p2, %p235_p1  ;;  %p34_p4 = scmp.ge.s32.totalorder %s2280_s12, 2 }
  0x10   : > { %p242_p6 = scmp.eq.s32.totalorder %s1503_s10, 3  ;;  %p1506_p7 = scmp.ge.s32.totalorder %s1906_s8, 1 }
  0x11   : > { %s2282_s12 = smov (%p34_p4, %s2280_s12), 0  ;;  %p312_p9 = scmp.lt.s32.totalorder %s1906_s8, 5 }
  0x12   : > { %2263 = sst [smem:[#allocation6_spill]] %s2282_s12  ;;  %p2013_p8 = por %p242_p6, %p241_p5 }
  0x13   : > { %s220_s16 = ssub.s32 %s1902_s30, %s2282_s12  ;;  %s225_s17 = sadd.s32 1, %s1886_s26 }
  0x14   : > { %s222_s18 = sor.u32 %s221_s13, %s220_s16  ;;  %p313_p10 = pnand %p1506_p7, %p312_p9 }
  0x15   : > { %p223_p11 = scmp.eq.s32.totalorder %s222_s18, 0  ;;  %p370_p12 = scmp.lt.s32.totalorder (!%p313_p10), %s1894_s28, 1  ;;  %v1908_v0 = vmov (!%p313_p10), 0.0   ;;  %vm1909_vm0 = vmmov (!%p313_p10), 0   ;;  %vm427_vm1 = vcmask (!%p313_p10), 261120   ;;  %vm539_vm2 = vcmask (!%p313_p10), 1043456  }
  0x16   : > { %316 = sbr.rel (%p313_p10) target bundleno = 4167 (0x1047), region = 48  ;;  %p372_p13 = scmp.lt.s32.totalorder (!%p313_p10), %s1890_s27, 1  ;;  %1607 = vmatprep.subr.bf16.mxu0 (!%p313_p10), %v1908_v0  ;;  %1611 = vmatprep.mubr.msk.bf16.mxu0 (!%p313_p10), %vm1909_vm0, %v1908_v0  ;;  %vm475_vm3 = vcmask (!%p313_p10), 64512  }
  0x17   : > { %s2022_s19 = scalar_select %p223_p11, %s1886_s26, %s225_s17  }
  0x18   : > { %1615 = vmatprep.subr.bf16.mxu1 (!%p313_p10), %v1908_v0  ;;  %1617 = vmatprep.mubr.msk.bf16.mxu1 (!%p313_p10), %vm1909_vm0, %v1908_v0  ;;  %s2265_s1 = sld [smem:[#allocation8_spill]] (!%p313_p10)  ;;  %s2266_s0 = sld [smem:[#allocation7_spill]] (!%p313_p10) }
  0x19   : > { %s2267_s2 = sld [smem:[#allocation9_spill]] (!%p313_p10)  ;;  %s1911_s12 = smov (!%p313_p10), 120  }
  0x1d   : > { %s2030_s20 = scalar_select %p370_p12, %s1894_s28, 1 }
  0x1e   : > { %s373_s21 = scalar_select %p372_p13, %s1890_s27, 1 }
  0x1f   : > { %s1569_s22 = sshll.u32 %s2030_s20, 6  ;;  %s1508_s23 = sshll.u32 %s2030_s20, 1 }
  0x20   : > { %s2041_s13 = scalar_lea.vmem %s2265_s1, %s1569_s22  ;;  %s375_s16 = sadd.s32 %s1508_s23, %s373_s21 }
  0x21   : > { %v1786_v1 = vld [vmem:[%s2041_s13] sm:$0xff]   ;;  %s1509_s17 = sshll.u32 %s375_s16, 2  ;;  %v1787_v2 = vld [vmem:[%s2041_s13 + $0x8] sm:$0xff]   ;;  %s1512_s21 = sshll.u32 %s2030_s20, 2  ;;  %v1788_v15 = vld [vmem:[%s2041_s13 + $0x10] sm:$0xff]  }
  0x22   : > { %1608 = vmatpush3.bf16.msra.mxu0 %v1786_v1  ;;  %s377_s11 = scalar_lea.vmem %s2266_s0, %s1509_s17  ;;  %s2060_s9 = scalar_lea.vmem %s2267_s2, %s1512_s21  ;;  %v1789_v16 = vld [vmem:[%s2041_s13 + $0x18] sm:$0xff]  }
  0x23   : > { %1609 = vmatprep.subr.bf16.mxu0 %v1908_v0  ;;  %v2049_v3 = vld [vmem:[%s377_s11] sm:$0xf]  ;;  %s1910_s11 = smov 112   ;;  %s1570_s10 = sshll.u32 %s2030_s20, 4 }
  0x24   : > { %v1515_v4 = vld [vmem:[%s2060_s9] ss:$0 sm:$0xff]  ;;  %v1526_v31 = vld [vmem:[%s2060_s9 + $0x1] ss:$0 sm:$0xff]  ;;  %s2099_s18 = scalar_lea.vmem %s2251_s3, %s1570_s10  ;;  %s394_s22 = scalar_lea.vmem %s2252_s4, %s2030_s20 }
  0x25   : > { %v1532_v54 = vld [vmem:[%s2099_s18 + $0x4] sm:$0xf]  ;;  %v584_v60 = vld [vmem:[%s2099_s18] sm:$0xf]  ;;  %s367_s23 = sand.u32 1, %s1882_s25   ;;  %s397_s16 = scalar_lea.vmem %s2253_s5, %s2030_s20 }
  0x26   : > { %1610 = vmatpush3.bf16.msra.mxu0 %v1787_v2  ;;  %v767_v55 = vsel %vm539_vm2, %v1532_v54, 0  ;;  %v813_v63 = vsel %vm539_vm2, %v584_v60, 0 }
  0x27   : > { %1621 = vmatprep.subr.bf16.mxu0 %v1908_v0 }
  0x29   : > { %1612 = vmatmul.mubr.msk.bf16.vlgmr.msra.gmra.mrb[0].mxu0 %vm427_vm1, %v2049_v3 }
  0x2a   : > { %1623 = vmatprep.mubr.msk.bf16.mxu0 %vm1909_vm0, %v1908_v0 }
  0xfc   : > { %v465_v5 = vpop.f32.mrb[0].mxu0 }
  0xfd   : > { %v466_v6 = vadd.f32 %v1515_v4, %v465_v5  ;;  %v1613_v7 = vpop.f32.mrb[1].mxu0  ;;  %v1790_v4 = vld [vmem:[%s2041_s13 + $0x20] sm:$0xff]  }
  0xfe   : > { %v468_v8 = vpop.f32.mrb[2].mxu0 }
  0xff   : > { %v471_v9 = vpack.c.bf16 %v466_v6, %v466_v6  ;;  %v1614_v10 = vpop.f32.mrb[3].mxu0 }
 0x101   : > { %534 = vrot.lane.b32.xlu1 %v471_v9, %s1910_s11  ;;  %473 = vrot.lane.b32.xlu0 %v471_v9, %s1911_s12 }
 0x173   : > { %v535_v11 = vpop.permute.xlu1 %534  ;;  %v474_v12 = vpop.permute.xlu0 %473 }
 0x174   : > { %v541_v13 = vsel %vm539_vm2, %v535_v11, 0  ;;  %v480_v14 = vsel %vm475_vm3, %v474_v12, 0 }
 0x175   : > { %1616 = vmatpush3.bf16.xpose.msra.mxu1 %v480_v14  ;;  %1622 = vmatpush3.bf16.msra.mxu0 %v541_v13 }
 0x176   : > { %1627 = vmatprep.subr.bf16.mxu1 %v1908_v0  ;;  %1635 = vmatprep.subr.bf16.mxu0 %v1908_v0 }
 0x17c   : > { %1618 = vmatmul.mubr.msk.bf16.vlgmr.msra.gmra.mrb[0].mxu1 %vm475_vm3, %v471_v9  ;;  %v1791_v9 = vld [vmem:[%s2041_s13 + $0x28] sm:$0xff]  }
 0x17d   : > { %1628 = vmatpush3.bf16.msra.mxu1 %v1788_v15  ;;  %1631 = vmatprep.mubr.msk.bf16.mxu1 %vm1909_vm0, %v1908_v0 }
 0x17e   : > { %1629 = vmatprep.subr.bf16.mxu1 %v1908_v0 }
 0x181   : > { %1630 = vmatpush3.bf16.msra.mxu1 %v1789_v16 }
 0x182   : > { %1641 = vmatprep.subr.bf16.mxu1 %v1908_v0 }
 0x184   : > { %1632 = vmatmul.mubr.msk.bf16.vlgmr.msra.gmra.mrb[4].mxu1 %vm427_vm1, %v2049_v3 }
 0x185   : > { %1643 = vmatprep.mubr.msk.bf16.mxu1 %vm1909_vm0, %v1908_v0 }
 0x24f   : > { %v516_v17 = vpop.f32.mrb[0].mxu1 }
 0x250   : > { %v1619_v18 = vpop.f32.mrb[1].mxu1  ;;  %v522_v19 = vsel %vm475_vm3, %v516_v17, -inf }
 0x251   : > { %523 = vmax.xlane.f32.xlu0 %v522_v19  ;;  %v519_v20 = vpop.f32.mrb[2].mxu1  ;;  %v1540_v19 = vld [vmem:[%s2060_s9 + $0x2] ss:$0 sm:$0xff] }
 0x252   : > { %v1620_v21 = vpop.f32.mrb[3].mxu1 }
 0x257   : > { %v644_v22 = vpop.f32.mrb[4].mxu1 }
 0x258   : > { %v1633_v23 = vpop.f32.mrb[5].mxu1  ;;  %v645_v32 = vadd.f32 %v1526_v31, %v644_v22 }
 0x259   : > { %v647_v24 = vpop.f32.mrb[6].mxu1 }
 0x25a   : > { %v1634_v25 = vpop.f32.mrb[7].mxu1  ;;  %v650_v33 = vpack.c.bf16 %v645_v32, %v645_v32 }
 0x2de   : > { %v524_v26 = vpop.xlane.xlu0 %523 }
 0x2df   : > { %v525_v27 = vsub.f32 %v516_v17, %v524_v26 }
 0x2e1   : > { %v526_v28 = vmul.f32 1.442695, %v525_v27 }
 0x2e3   : > { %1794 = vpow2.f32 %v526_v28 }
 0x2ed   : > { %v1795_v29 = vpop.eup %1794 }
 0x2ee   : > { %v528_v30 = vsel %vm475_vm3, %v1795_v29, 0.0 }
 0x2ef   : > { %529 = vadd.xlane.f32.xlu1 %v528_v30 }
 0x300   : > { %652 = vrot.lane.b32.xlu1 %v650_v33, %s1911_s12 }
 0x37c   : > { %v530_v34 = vpop.xlane.xlu1 %529 }
 0x37d   : > { %1796 = vrcp.f32 %v530_v34 }
 0x380   : > { %v653_v36 = vpop.permute.xlu1 %652 }
 0x381   : > { %v658_v38 = vsel %vm475_vm3, %v653_v36, 0 }
 0x387   : > { %v1797_v35 = vpop.eup %1796 }
 0x388   : > { %v532_v37 = vmul.f32 %v1797_v35, %v1795_v29 }
 0x38a   : > { %v533_v39 = vpack.c.bf16 %v532_v37, %v532_v37 }
 0x38c   : > { %1624 = vmatmul.mubr.msk.bf16.vlgmr.msra.gmra.mrb[4].mxu0 %vm475_vm3, %v533_v39 }
 0x38d   : > { %1636 = vmatpush3.bf16.xpose.msra.mxu0 %v658_v38  ;;  %1637 = vmatprep.mubr.msk.bf16.mxu0 %vm1909_vm0, %v1908_v0 }
 0x38e   : > { %1647 = vmatprep.subr.bf16.mxu0 %v1908_v0 }
 0x394   : > { %1638 = vmatmul.mubr.msk.bf16.vlgmr.msra.gmra.mrb[8].mxu0 %vm475_vm3, %v650_v33 }
 0x395   : > { %1649 = vmatprep.mubr.msk.bf16.mxu0 %vm1909_vm0, %v1908_v0  ;;  %1648 = vmatpush3.bf16.msra.mxu0 %v767_v55 }
 0x396   : > { %1659 = vmatprep.subr.bf16.mxu0 %v1908_v0 }
 0x45f   : > { %v577_v40 = vpop.f32.mrb[4].mxu0 }
 0x460   : > { %v1625_v41 = vpop.f32.mrb[5].mxu0  ;;  %v583_v1 = vpack.c.bf16 %v577_v40, %v577_v40 }
 0x461   : > { %v580_v42 = vpop.f32.mrb[6].mxu0 }
 0x462   : > { %v1626_v43 = vpop.f32.mrb[7].mxu0 }
 0x463   : > { %v1792_v43 = vld [vmem:[%s2041_s13 + $0x30] sm:$0xff]  }
 0x467   : > { %v694_v44 = vpop.f32.mrb[8].mxu0 }
 0x468   : > { %v1639_v45 = vpop.f32.mrb[9].mxu0  ;;  %v700_v46 = vsel %vm475_vm3, %v694_v44, -inf }
 0x469   : > { %701 = vmax.xlane.f32.xlu1 %v700_v46  ;;  %v697_v47 = vpop.f32.mrb[10].mxu0  ;;  %v1793_v45 = vld [vmem:[%s2041_s13 + $0x38] sm:$0xff]   ;;  %v1546_v46 = vld [vmem:[%s2099_s18 + $0x8] sm:$0xf]  ;;  %s400_s13 = scalar_lea.vmem %s2254_s6, %s2030_s20 }
 0x46a   : > { %v1640_v48 = vpop.f32.mrb[11].mxu0  ;;  %v1037_v47 = vsel %vm539_vm2, %v1546_v46, 0 }
 0x4f6   : > { %v702_v49 = vpop.xlane.xlu1 %701 }
 0x4f7   : > { %v703_v50 = vsub.f32 %v694_v44, %v702_v49 }
 0x4f9   : > { %v704_v51 = vmul.f32 1.442695, %v703_v50 }
 0x4fb   : > { %1798 = vpow2.f32 %v704_v51 }
 0x505   : > { %v1799_v52 = vpop.eup %1798 }
 0x506   : > { %v706_v53 = vsel %vm475_vm3, %v1799_v52, 0.0 }
 0x507   : > { %707 = vadd.xlane.f32.xlu0 %v706_v53  ;;  %v1553_v53 = vld [vmem:[%s2060_s9 + $0x3] ss:$0 sm:$0xff]  ;;  %s1507_s9 = sshll.u32 %s367_s23, 3 }
 0x508   : > { %s369_s0 = scalar_lea.vmem [#allocation2], %s1507_s9  ;;  %s1912_s9 = smov [#allocation2]  }
 0x509   : > { %s1361_s1 = sshll.u32 %s369_s0, 4  ;;  %s2196_s1 = int_to_ptr.vmem [resolvable:$true] %s1361_s1 }
 0x50a   : > { %s1812_s20 = scalar_lea.vmem %s2196_s1, 128 }
 0x50b   : > { %p1813_p0 = scmp.ne.s32.totalorder %s2196_s1, %s1812_s20 }
 0x50d   : > { %p1814_p1 = pnand %p1813_p0, %p2004_p3 }
 0x50f   : > { %p1815_p2 = pneg %p1814_p1 }
 0x51d   : > { %712 = vrot.lane.b32.xlu0 %v650_v33, %s1910_s11 }
 0x594   : > { %v708_v56 = vpop.xlane.xlu0 %707 }
 0x595   : > { %1800 = vrcp.f32 %v708_v56 }
 0x598   : > { %v713_v57 = vpop.permute.xlu0 %712 }
 0x599   : > { %v718_v58 = vsel %vm539_vm2, %v713_v57, 0 }
 0x59a   : > { %1642 = vmatpush3.bf16.msra.mxu1 %v718_v58 }
 0x59b   : > { %1653 = vmatprep.subr.bf16.mxu1 %v1908_v0 }
 0x59f   : > { %v1801_v59 = vpop.eup %1800 }
 0x5a0   : > { %v710_v61 = vmul.f32 %v1801_v59, %v1799_v52 }
 0x5a2   : > { %v711_v62 = vpack.c.bf16 %v710_v61, %v710_v61 }
 0x5a4   : > { %1644 = vmatmul.mubr.msk.bf16.vlgmr.msra.gmra.mrb[8].mxu1 %vm475_vm3, %v711_v62 }
 0x5a5   : > { %1654 = vmatpush3.bf16.msra.mxu1 %v813_v63  ;;  %1655 = vmatprep.mubr.msk.bf16.mxu1 %vm1909_vm0, %v1908_v0 }
 0x5a6   : > { %1667 = vmatprep.subr.bf16.mxu1 %v1908_v0 }
 0x5ac   : > { %1656 = vmatmul.mubr.msk.bf16.vlgmr.msra.gmra.mrb[12].mxu1 %vm475_vm3, %v583_v1 }
 0x5ad   : > { %1669 = vmatprep.mubr.msk.bf16.mxu1 %vm1909_vm0, %v1908_v0 }
 0x677   : > { %v754_v2 = vpop.f32.mrb[8].mxu1 }
 0x678   : > { %v760_v5 = vpack.c.bf16 %v754_v2, %v754_v2  ;;  %v1645_v6 = vpop.f32.mrb[9].mxu1 }
 0x679   : > { %v757_v7 = vpop.f32.mrb[10].mxu1 }
 0x67a   : > { %v1646_v8 = vpop.f32.mrb[11].mxu1  ;;  %1650 = vmatmul.mubr.msk.bf16.vlgmr.msra.gmra.mrb[12].mxu0 %vm475_vm3, %v760_v5 }
 0x67b   : > { %1660 = vmatpush3.bf16.msra.mxu0 %v1790_v4  ;;  %1663 = vmatprep.mubr.msk.bf16.mxu0 %vm1909_vm0, %v1908_v0 }
 0x67c   : > { %1661 = vmatprep.subr.bf16.mxu0 %v1908_v0 }
 0x67f   : > { %v849_v10 = vpop.f32.mrb[12].mxu1  ;;  %1662 = vmatpush3.bf16.msra.mxu0 %v1791_v9 }
 0x680   : > { %v1657_v11 = vpop.f32.mrb[13].mxu1  ;;  %1673 = vmatprep.subr.bf16.mxu0 %v1908_v0 }
 0x681   : > { %v852_v12 = vpop.f32.mrb[14].mxu1 }
 0x682   : > { %v1658_v13 = vpop.f32.mrb[15].mxu1  ;;  %1664 = vmatmul.mubr.msk.bf16.vlgmr.msra.gmra.mrb[16].mxu0 %vm427_vm1, %v2049_v3 }
 0x683   : > { %1675 = vmatprep.mubr.msk.bf16.mxu0 %vm1909_vm0, %v1908_v0 }
 0x74d   : > { %v803_v14 = vpop.f32.mrb[12].mxu0 }
 0x74e   : > { %v2126_v15 = vadd.f32 %v849_v10, %v803_v14  ;;  %v1651_v16 = vpop.f32.mrb[13].mxu0  ;;  %v1559_v14 = vld [vmem:[%s2099_s18 + $0xc] sm:$0xf] }
 0x74f   : > { %v806_v17 = vpop.f32.mrb[14].mxu0 }
 0x750   : > { %v1652_v18 = vpop.f32.mrb[15].mxu0 }
 0x755   : > { %v914_v20 = vpop.f32.mrb[16].mxu0 }
 0x756   : > { %v915_v21 = vadd.f32 %v1540_v19, %v914_v20  ;;  %v1665_v22 = vpop.f32.mrb[17].mxu0 }
 0x757   : > { %v917_v23 = vpop.f32.mrb[18].mxu0 }
 0x758   : > { %v920_v24 = vpack.c.bf16 %v915_v21, %v915_v21  ;;  %v1666_v25 = vpop.f32.mrb[19].mxu0 }
 0x75a   : > { %922 = vrot.lane.b32.xlu0 %v920_v24, %s1911_s12 }
 0x7cc   : > { %v923_v26 = vpop.permute.xlu0 %922 }
 0x7cd   : > { %v928_v27 = vsel %vm475_vm3, %v923_v26, 0 }
 0x7ce   : > { %1668 = vmatpush3.bf16.xpose.msra.mxu1 %v928_v27  ;;  %v403_v27 = vunpack.c.l.bf16 %v2049_v3 }
 0x7cf   : > { %1679 = vmatprep.subr.bf16.mxu1 %v1908_v0 }
 0x7d5   : > { %1670 = vmatmul.mubr.msk.bf16.vlgmr.msra.gmra.mrb[16].mxu1 %vm475_vm3, %v920_v24 }
 0x7d6   : > { %1681 = vmatprep.mubr.msk.bf16.mxu1 %vm1909_vm0, %v1908_v0  ;;  %1680 = vmatpush3.bf16.msra.mxu1 %v1037_v47  ;;  %v1563_v47 = vld [vmem:[%s400_s13] ss:$0 sm:$0xff] }
 0x7d7   : > { %1693 = vmatprep.subr.bf16.mxu1 %v1908_v0 }
 0x8a8   : > { %v964_v28 = vpop.f32.mrb[16].mxu1 }
 0x8a9   : > { %v1671_v29 = vpop.f32.mrb[17].mxu1  ;;  %v970_v30 = vsel %vm475_vm3, %v964_v28, -inf }
 0x8aa   : > { %971 = vmax.xlane.f32.xlu1 %v970_v30  ;;  %v967_v31 = vpop.f32.mrb[18].mxu1 }
 0x8ab   : > { %v1672_v32 = vpop.f32.mrb[19].mxu1 }
 0x8ac   : > { %v1561_v32 = vld [vmem:[%s394_s22] ss:$0 sm:$0xff] }
 0x8bb   : > { %982 = vrot.lane.b32.xlu1 %v920_v24, %s1910_s11 }
 0x937   : > { %v972_v33 = vpop.xlane.xlu1 %971 }
 0x938   : > { %v973_v34 = vsub.f32 %v964_v28, %v972_v33 }
 0x93a   : > { %v974_v35 = vmul.f32 1.442695, %v973_v34 }
 0x93b   : > { %v983_v36 = vpop.permute.xlu1 %982 }
 0x93c   : > { %1802 = vpow2.f32 %v974_v35  ;;  %v988_v37 = vsel %vm539_vm2, %v983_v36, 0 }
 0x93d   : > { %1674 = vmatpush3.bf16.msra.mxu0 %v988_v37 }
 0x93e   : > { %1685 = vmatprep.subr.bf16.mxu0 %v1908_v0 }
 0x946   : > { %v1803_v38 = vpop.eup %1802 }
 0x947   : > { %v976_v39 = vsel %vm475_vm3, %v1803_v38, 0.0 }
 0x948   : > { %977 = vadd.xlane.f32.xlu0 %v976_v39 }
 0x9d5   : > { %v978_v40 = vpop.xlane.xlu0 %977 }
 0x9d6   : > { %1804 = vrcp.f32 %v978_v40 }
 0x9e0   : > { %v1805_v41 = vpop.eup %1804 }
 0x9e1   : > { %v980_v42 = vmul.f32 %v1805_v41, %v1803_v38 }
 0x9e3   : > { %v981_v44 = vpack.c.bf16 %v980_v42, %v980_v42 }
 0x9e5   : > { %1676 = vmatmul.mubr.msk.bf16.vlgmr.msra.gmra.mrb[20].mxu0 %vm475_vm3, %v981_v44 }
 0x9e6   : > { %1686 = vmatpush3.bf16.msra.mxu0 %v1792_v43  ;;  %1689 = vmatprep.mubr.msk.bf16.mxu0 %vm1909_vm0, %v1908_v0 }
 0x9e7   : > { %1687 = vmatprep.subr.bf16.mxu0 %v1908_v0 }
 0x9ea   : > { %1688 = vmatpush3.bf16.msra.mxu0 %v1793_v45  ;;  %v1562_v45 = vld [vmem:[%s397_s16] ss:$0 sm:$0xff] }
 0x9eb   : > { %1699 = vmatprep.subr.bf16.mxu0 %v1908_v0 }
 0x9ed   : > { %1690 = vmatmul.mubr.msk.bf16.vlgmr.msra.gmra.mrb[24].mxu0 %vm427_vm1, %v2049_v3 }
 0x9ee   : > { %1701 = vmatprep.mubr.msk.bf16.mxu0 %vm1909_vm0, %v1908_v0 }
 0xab8   : > { %v1024_v48 = vpop.f32.mrb[20].mxu0 }
 0xab9   : > { %v1030_v49 = vpack.c.bf16 %v1024_v48, %v1024_v48  ;;  %v1677_v50 = vpop.f32.mrb[21].mxu0 }
 0xaba   : > { %v1027_v51 = vpop.f32.mrb[22].mxu0 }
 0xabb   : > { %v1678_v52 = vpop.f32.mrb[23].mxu0  ;;  %1682 = vmatmul.mubr.msk.bf16.vlgmr.msra.gmra.mrb[20].mxu1 %vm475_vm3, %v1030_v49 }
 0xabc   : > { %1695 = vmatprep.mubr.msk.bf16.mxu1 %vm1909_vm0, %v1908_v0 }
 0xac0   : > { %v1139_v54 = vpop.f32.mrb[24].mxu0 }
 0xac1   : > { %v1140_v55 = vadd.f32 %v1553_v53, %v1139_v54  ;;  %v1691_v56 = vpop.f32.mrb[25].mxu0 }
 0xac2   : > { %v1142_v57 = vpop.f32.mrb[26].mxu0 }
 0xac3   : > { %v1145_v58 = vpack.c.bf16 %v1140_v55, %v1140_v55  ;;  %v1692_v59 = vpop.f32.mrb[27].mxu0 }
 0xac5   : > { %1147 = vrot.lane.b32.xlu1 %v1145_v58, %s1911_s12 }
 0xb37   : > { %v1148_v60 = vpop.permute.xlu1 %1147 }
 0xb38   : > { %v1153_v61 = vsel %vm475_vm3, %v1148_v60, 0 }
 0xb39   : > { %1694 = vmatpush3.bf16.xpose.msra.mxu1 %v1153_v61 }
 0xb3a   : > { %1705 = vmatprep.subr.bf16.mxu1 %v1908_v0 }
 0xb40   : > { %1696 = vmatmul.mubr.msk.bf16.vlgmr.msra.gmra.mrb[24].mxu1 %vm475_vm3, %v1145_v58 }
 0xb41   : > { %1707 = vmatprep.mubr.msk.bf16.mxu1 %vm1909_vm0, %v1908_v0 }
 0xb8e   : > { %v1073_v62 = vpop.f32.mrb[20].mxu1 }
 0xb8f   : > { %v1079_v63 = vadd.f32 %v1073_v62, %v2126_v15  ;;  %v1683_v1 = vpop.f32.mrb[21].mxu1  ;;  %v1262_v15 = vsel %vm539_vm2, %v1559_v14, 0 }
 0xb90   : > { %v1076_v2 = vpop.f32.mrb[22].mxu1  ;;  %1706 = vmatpush3.bf16.msra.mxu1 %v1262_v15 }
 0xb91   : > { %v1684_v4 = vpop.f32.mrb[23].mxu1 }
 0xc13   : > { %v1189_v5 = vpop.f32.mrb[24].mxu1 }
 0xc14   : > { %v1697_v6 = vpop.f32.mrb[25].mxu1  ;;  %v1195_v7 = vsel %vm475_vm3, %v1189_v5, -inf }
 0xc15   : > { %1196 = vmax.xlane.f32.xlu1 %v1195_v7  ;;  %v1192_v8 = vpop.f32.mrb[26].mxu1 }
 0xc16   : > { %v1698_v9 = vpop.f32.mrb[27].mxu1 }
 0xca2   : > { %v1197_v10 = vpop.xlane.xlu1 %1196 }
 0xca3   : > { %v1198_v11 = vsub.f32 %v1189_v5, %v1197_v10 }
 0xca5   : > { %v1199_v12 = vmul.f32 1.442695, %v1198_v11 }
 0xca7   : > { %1806 = vpow2.f32 %v1199_v12 }
 0xcb1   : > { %v1807_v13 = vpop.eup %1806 }
 0xcb2   : > { %v1201_v0 = vsel %vm475_vm3, %v1807_v13, 0.0 }
 0xcb3   : > { %1202 = vadd.xlane.f32.xlu0 %v1201_v0 }
 0xcc9   : > { %1207 = vrot.lane.b32.xlu0 %v1145_v58, %s1910_s11  ;;  %s1565_s11 = sshll.u32 %s1894_s28, 1 }
 0xcca   : > { %s1357_s21 = sadd.s32 %s1890_s27, %s1565_s11  ;;  %s1346_s27 = scalar_lea.sflag [#allocation3], %s367_s23 }
 0xccb   : > { %s1566_s22 = sshll.u32 %s1357_s21, 7  ;;  %s1816_s11 = sshll.u32 %s1912_s9, 4  ;;  %s1817_s11 = int_to_ptr.vmem [resolvable:$false] %s1816_s11 }
 0xccc   : > { %s2194_s12 = scalar_lea.hbm %s2255_s7, %s1566_s22  ;;  %s1818_s10 = scalar_lea.vmem %s1817_s11, 256 }
 0xccd   : > { %p1819_p4 = scmp.lt.s32.totalorder %s2196_s1, %s1817_s11  ;;  %p1820_p5 = scmp.lt.s32.totalorder %s1818_s10, %s1812_s20 }
 0xccf   : > { %p1821_p6 = por %p1820_p5, %p1819_p4 }
 0xcd1   : > { %p1822_p7 = pnand %p1821_p6, %p1815_p2 }
 0xd40   : > { %v1203_v16 = vpop.xlane.xlu0 %1202 }
 0xd41   : > { %1808 = vrcp.f32 %v1203_v16 }
 0xd44   : > { %v1208_v17 = vpop.permute.xlu0 %1207 }
 0xd45   : > { %v1213_v18 = vsel %vm539_vm2, %v1208_v17, 0 }
 0xd46   : > { %1700 = vmatpush3.bf16.msra.mxu0 %v1213_v18 }
 0xd4b   : > { %v1809_v19 = vpop.eup %1808 }
 0xd4c   : > { %v1205_v20 = vmul.f32 %v1809_v19, %v1807_v13 }
 0xd4e   : > { %v1206_v21 = vpack.c.bf16 %v1205_v20, %v1205_v20 }
 0xd50   : > { %1702 = vmatmul.mubr.msk.bf16.vlgmr.msra.gmra.mrb[28].mxu0 %vm475_vm3, %v1206_v21 }
 0xe23   : > { %v1249_v22 = vpop.f32.mrb[28].mxu0 }
 0xe24   : > { %v1255_v23 = vpack.c.bf16 %v1249_v22, %v1249_v22  ;;  %v1703_v24 = vpop.f32.mrb[29].mxu0 }
 0xe25   : > { %v1252_v25 = vpop.f32.mrb[30].mxu0 }
 0xe26   : > { %v1704_v26 = vpop.f32.mrb[31].mxu0  ;;  %1708 = vmatmul.mubr.msk.bf16.vlgmr.msra.gmra.mrb[28].mxu1 %vm475_vm3, %v1255_v23 }
 0xef9   : > { %v1298_v28 = vpop.f32.mrb[28].mxu1 }
 0xefa   : > { %v1304_v29 = vadd.f32 %v1298_v28, %v1079_v63  ;;  %v1709_v30 = vpop.f32.mrb[29].mxu1 }
 0xefb   : > { %v1301_v31 = vpop.f32.mrb[30].mxu1 }
 0xefc   : > { %v1305_v33 = vadd.f32 %v1304_v29, %v403_v27  ;;  %v1710_v34 = vpop.f32.mrb[31].mxu1 }
 0xefe   : > { %v1313_v35 = vadd.f32 %v1561_v32, %v1305_v33 }
 0xf00   : > { %v1314_v36 = vsel %vm427_vm1, %v1313_v35, 0.0 }
 0xf01   : > { %1315 = vadd.xlane.f32.xlu0 %v1314_v36 }
 0xf8e   : > { %v1316_v3 = vpop.xlane.xlu0 %1315 }
 0xf8f   : > { %v1318_v37 = vmul.f32 0.03125, %v1316_v3 }
 0xf91   : > { %v1319_v38 = vsub.f32 %v1313_v35, %v1318_v37 }
 0xf93   : > { %v1320_v39 = vmul.f32 %v1319_v38, %v1319_v38 }
 0xf95   : > { %v1321_v40 = vsel %vm427_vm1, %v1320_v39, 0.0 }
 0xf96   : > { %1322 = vadd.xlane.f32.xlu1 %v1321_v40 }
0x1023   : > { %v1323_v41 = vpop.xlane.xlu1 %1322 }
0x1024   : > { %v1324_v42 = vmul.f32 0.03125, %v1323_v41 }
0x1026   : > { %v1325_v43 = vadd.f32 1e-05, %v1324_v42 }
0x1028   : > { %1810 = vrsqrt.f32 %v1325_v43 }
0x1032   : > { %v1811_v44 = vpop.eup %1810 }
0x1033   : > { %v1327_v46 = vmul.f32 %v1811_v44, %v1319_v38 }
0x1035   : > { %v1335_v48 = vmul.f32 %v1562_v45, %v1327_v46 }
0x1037   : > { %v1343_v49 = vadd.f32 %v1563_v47, %v1335_v48 }
0x1039   : > { %1344 = vst.msk [vmem:[%s369_s0] sm:$0xff] %vm427_vm1, %v1343_v49 }
0x103a   : > { %1825 = shalt.err (!%p1822_p7)
}
0x103b   : > { %s1826_s0 = scalar_lea.hbm %s2194_s12, 128  ;;  %s1830_s16 = scalar_lea.hbm %s2255_s7, 512 }
0x103c   : > { %p1827_p9 = scmp.ne.s32.totalorder %s2194_s12, %s1826_s0  ;;  %p1831_p12 = scmp.lt.u32.totalorder %s2194_s12, %s2255_s7 }
0x103d   : > { %p1832_p13 = scmp.lt.u32.totalorder %s1830_s16, %s1826_s0  ;;  %p1834_p1 = scmp.lt.u32.totalorder %s1826_s0, %s2194_s12 }
0x103e   : > { %p1828_p10 = pnand %p1827_p9, %p2004_p3 }
0x103f   : > { %p1833_p0 = por %p1832_p13, %p1831_p12 }
0x1040   : > { %p1829_p11 = pneg %p1828_p10 }
0x1041   : > { %p1835_p2 = por %p1834_p1, %p1833_p0 }
0x1043   : > { %p1836_p4 = pnand %p1835_p2, %p1829_p11 }
0x1045   : > { %1839 = shalt.err (!%p1836_p4)
}
0x1046   : > { %1711 = dma.vmem_to_hbm [thread:$0]  (%p2004_p3), %s2196_s1, 128, %s2194_s12, %s1346_s27  }
0x1047 PF: > { %p1717_p5 = scmp.ge.s32.totalorder %s1906_s8, 2  ;;  %s1373_s13 = sand.u32 1, %s1878_s24  }
0x1048   : > { %s1374_s21 = scalar_lea.sflag [#allocation3], %s1373_s13 }
0x1049   : > { %p1714_p6 = pnand %p1717_p5, %p2013_p8 }
0x104b   : > { %1873 = dma.done.wait (!%p1714_p6), %s1374_s21, 128  }
0x104c   : > { %1875 = vsyncadd (!%p1714_p6), %s1374_s21, 4294967168  ;;  %s20_s8 = sadd.s32 1, %s1906_s8   ;;  %s2268_s1 = sld [smem:[#allocation5_spill]] }
0x104d   : > { %p17_p7 = scmp.ge.s32.totalorder %s20_s8, 6   ;;  %s2269_s14 = sld [smem:[#allocation6_spill]] }
0x104e   : > { %s2270_s24 = smov %s1882_s25  ;;  %s2271_s25 = smov %s1886_s26 }
0x104f   : > { %s2272_s26 = smov %s2022_s19  ;;  %s2273_s27 = smov %s1898_s29 }
0x1050   : > { %s2274_s28 = smov %s1902_s30  ;;  %19 = sbr.rel (!%p17_p7) target bundleno = 9 (0x9), region = 110 }
0x1052   : > { %s2275_s29 = smov %s2268_s1 }
0x1053   : > { %s2276_s30 = smov %s2269_s14 }
0x1057   :  { %1379 = vsyncpa [#allocation3], 1 }
0x1058   :  { %1381 = vsyncpa [#allocation3 + $0x1], 1 }

</bundles_post_ra>
